<compile_context>
chip_gen: v5e
topology: v5e:2x2
jax: 0.10.0
libtpu: 0.0.40
codegen_flags: <defaults>
</compile_context>

<pallas_src>
import math
from functools import partial

import jax
import jax.numpy as jnp
from jax import lax
from jax.experimental import pallas as pl
from jax.experimental.pallas import tpu as pltpu


def _round_up(x, m):
    return ((x + m - 1) // m) * m


# -----------------------------------------------------------------------------
# Generation detection (VMEM capacity drives tile caps / vmem limit)
# -----------------------------------------------------------------------------
def _vmem_capacity_bytes():
    try:
        return int(pltpu.get_tpu_info().vmem_capacity_bytes)
    except Exception:
        try:
            kind = jax.devices()[0].device_kind.lower()
        except Exception:
            kind = ""
        if ("v5" in kind) or ("v6" in kind):
            return 128 * 1024 * 1024
        # unknown / v7x: be conservative
        return 64 * 1024 * 1024


_VMEM_BYTES = _vmem_capacity_bytes()
_BIG_VMEM = _VMEM_BYTES >= 100 * 1024 * 1024          # v5e / v6e
_VMEM_LIMIT = (100 << 20) if _BIG_VMEM else (48 << 20)


# -----------------------------------------------------------------------------
# Pallas tiled matmul kernel: bf16 A  x  int8 B (dequant in-kernel) -> f32 acc
# Per-output-channel scale + optional ReLU fused into the epilogue; bf16 out.
# -----------------------------------------------------------------------------
def _mm_kernel(a_ref, b_ref, s_ref, o_ref, acc_ref, *, relu):
    @pl.when(pl.program_id(2) == 0)
    def _():
        acc_ref[...] = jnp.zeros_like(acc_ref)

    acc_ref[...] += jnp.dot(a_ref[...], b_ref[...].astype(jnp.bfloat16),
                            preferred_element_type=jnp.float32)

    @pl.when(pl.program_id(2) == pl.num_programs(2) - 1)
    def _():
        y = acc_ref[...] * s_ref[...]          # (tm,tn) * (1,tn) channel scale
        if relu:
            y = jnp.maximum(y, 0.0)            # fused ReLU epilogue
        o_ref[...] = y.astype(o_ref.dtype)


def _choose_tiles(M, K, N):
    """Generation-aware tile selection shared by packer and matmul wrapper."""
    Kp = _round_up(K, 128)
    Np = _round_up(N, 128)
    tm = min(512, _round_up(M, 16))            # multiple of 16: full bf16 packing

    if _BIG_VMEM:                              # v5e / v6e: 128 MiB VMEM, 1 TC
        tn = min(Np, 512)
        tk_cap = 8192
    else:                                      # v7x-style: 64 MiB VMEM, 2 TCs
        tn = 128 if Np == 256 else min(Np, 256)
        tk_cap = 2048
        # make sure at least one "parallel" grid axis has >=2 blocks so the
        # second TensorCore is not idle
        if (Np // tn) < 2 and M >= 32:
            tm = min(tm, _round_up((M + 1) // 2, 16))

    Mp = _round_up(M, tm)                      # tm always divides Mp

    def pick_tk(cap):
        t = (min(Kp, cap) // 128) * 128
        while t > 128:
            if Kp % t == 0:
                return t
            t -= 128
        return 128

    tk = pick_tk(tk_cap)
    budget = int(_VMEM_LIMIT * 0.6)
    while tk > 128:
        need = (2 * tm * tk * 2        # A bf16, double-buffered
                + 2 * tk * tn * 1      # B int8, double-buffered
                + tk * tn * 2          # dequantized B temporary (bf16)
                + tm * tn * 4          # f32 accumulator scratch
                + 2 * tm * tn * 2)     # bf16 output, double-buffered
        if need <= budget:
            break
        tk = pick_tk(tk - 128)
    return tm, tk, tn, Mp, Kp, Np


def pallas_matmul_packed(a, b_packed, scale, K, N, relu=False,
                         out_dtype=jnp.bfloat16):
    """a: (M,K) float, b_packed: (Kp,Np) int8, scale: (1,Np) f32 -> (M,N)."""
    M = a.shape[0]
    tm, tk, tn, Mp, Kp, Np = _choose_tiles(M, K, N)
    assert b_packed.shape == (Kp, Np), (b_packed.shape, (Kp, Np))

    a = a.astype(jnp.bfloat16)
    if (Mp, Kp) != (M, K):
        a = jnp.pad(a, ((0, Mp - M), (0, Kp - K)))

    grid = (Mp // tm, Np // tn, Kp // tk)
    out_isize = jnp.dtype(out_dtype).itemsize
    cost = pl.CostEstimate(
        flops=2 * Mp * Kp * Np,
        transcendentals=0,
        bytes_accessed=Mp * Kp * 2 + Kp * Np * 1 + Mp * Np * out_isize + Np * 4)

    out = pl.pallas_call(
        partial(_mm_kernel, relu=relu),
        out_shape=jax.ShapeDtypeStruct((Mp, Np), out_dtype),
        grid_spec=pltpu.PrefetchScalarGridSpec(
            num_scalar_prefetch=0,
            grid=grid,
            in_specs=[
                pl.BlockSpec((tm, tk), lambda i, j, k: (i, k)),
                pl.BlockSpec((tk, tn), lambda i, j, k: (k, j)),
                pl.BlockSpec((1, tn), lambda i, j, k: (0, j)),
            ],
            out_specs=pl.BlockSpec((tm, tn), lambda i, j, k: (i, j)),
            scratch_shapes=[pltpu.VMEM((tm, tn), jnp.float32)],
        ),
        compiler_params=pltpu.CompilerParams(
            dimension_semantics=("parallel", "parallel", "arbitrary"),
            vmem_limit_bytes=_VMEM_LIMIT),
        cost_estimate=cost,
    )(a, b_packed, scale)

    if (Mp, Np) != (M, N):
        out = out[:M, :N]
    return out


# -----------------------------------------------------------------------------
# Pre-packed conv weights (pytree with static metadata)
# -----------------------------------------------------------------------------
@jax.tree_util.register_pytree_node_class
class PackedConv:
    """Conv weight stored once as padded (Kp,Np) int8 + (1,Np) f32 scale."""

    def __init__(self, w, scale, kh, kw, cin, cout, stride, padding):
        self.w = w
        self.scale = scale
        self.kh = kh
        self.kw = kw
        self.cin = cin
        self.cout = cout
        self.stride = stride
        self.padding = padding

    def tree_flatten(self):
        return (self.w, self.scale), (self.kh, self.kw, self.cin, self.cout,
                                      self.stride, self.padding)

    @classmethod
    def tree_unflatten(cls, aux, children):
        return cls(children[0], children[1], *aux)


# -----------------------------------------------------------------------------
# Conv / BN / pooling / upsample building blocks (used inside block-level jits)
# -----------------------------------------------------------------------------
def apply_conv(x, pc, relu=False, out_dtype=jnp.bfloat16):
    """x: (N,H,W,Cin) NHWC -> (N,Ho,Wo,Cout)."""
    n, h, w, cin = x.shape
    assert cin == pc.cin
    kh, kw, s, pad = pc.kh, pc.kw, pc.stride, pc.padding
    ho = (h + 2 * pad - kh) // s + 1
    wo = (w + 2 * pad - kw) // s + 1

    xb = x.astype(jnp.bfloat16)
    if pad:
        xb = jnp.pad(xb, ((0, 0), (pad, pad), (pad, pad), (0, 0)))

    cols = []
    for dy in range(kh):
        for dx in range(kw):
            cols.append(xb[:, dy:dy + s * ho:s, dx:dx + s * wo:s, :])
    patches = cols[0] if len(cols) == 1 else jnp.concatenate(cols, axis=-1)
    a = patches.reshape(n * ho * wo, kh * kw * cin)

    y = pallas_matmul_packed(a, pc.w, pc.scale, kh * kw * cin, pc.cout,
                             relu=relu, out_dtype=out_dtype)
    return y.reshape(n, ho, wo, pc.cout)


def batchnorm(x, relu=False, eps=1e-5):
    # training-mode BatchNorm2d (gamma=1, beta=0, biased var); stats in f32
    xf = x.astype(jnp.float32)
    mean = jnp.mean(xf, axis=(0, 1, 2), keepdims=True)
    msq = jnp.mean(xf * xf, axis=(0, 1, 2), keepdims=True)
    var = jnp.maximum(msq - mean * mean, 0.0)
    y = (xf - mean) * lax.rsqrt(var + eps)
    if relu:
        y = jnp.maximum(y, 0.0)
    return y.astype(jnp.bfloat16)


def _maxpool(x, k, stride, padding):
    init = jnp.array(-jnp.inf, x.dtype)
    return lax.reduce_window(
        x, init, lax.max,
        (1, k, k, 1), (1, stride, stride, 1),
        ((0, 0), (padding, padding), (padding, padding), (0, 0)))


def _lin_coords(out_size, in_size):
    # PyTorch bilinear, align_corners=False
    src = (jnp.arange(out_size, dtype=jnp.float32) + 0.5) * (in_size / out_size) - 0.5
    src = jnp.maximum(src, 0.0)
    i0 = jnp.minimum(jnp.floor(src).astype(jnp.int32), in_size - 1)
    i1 = jnp.minimum(i0 + 1, in_size - 1)
    lam = src - i0.astype(jnp.float32)
    return i0, i1, lam


def upsample2x_bilinear(x):
    n, h, w, c = x.shape
    i0h, i1h, lh = _lin_coords(2 * h, h)
    i0w, i1w, lw = _lin_coords(2 * w, w)
    xf = x.astype(jnp.float32)
    top = xf[:, i0h, :, :]
    bot = xf[:, i1h, :, :]
    xh = top * (1.0 - lh)[None, :, None, None] + bot * lh[None, :, None, None]
    left = xh[:, :, i0w, :]
    right = xh[:, :, i1w, :]
    return left * (1.0 - lw)[None, None, :, None] + right * lw[None, None, :, None]


# -----------------------------------------------------------------------------
# Block-level jitted forwards (coarse granularity: fewer dispatches, XLA fuses
# pad / im2col / BN / ReLU glue around the Pallas matmuls)
# -----------------------------------------------------------------------------
@jax.jit
def stem_fwd(images_nchw, pc):
    x = jnp.transpose(images_nchw.astype(jnp.float32), (0, 2, 3, 1))  # NHWC
    y = batchnorm(apply_conv(x, pc), relu=True)
    return _maxpool(y, 3, 2, 1)


@jax.jit
def bottleneck_fwd(x, p):
    residual = x
    if "ds" in p:
        residual = batchnorm(apply_conv(x, p["ds"]))
    out = batchnorm(apply_conv(x, p["conv1"]), relu=True)
    out = batchnorm(apply_conv(out, p["conv2"]), relu=True)
    out = batchnorm(apply_conv(out, p["conv3"]))
    return jnp.maximum(out + residual, 0.0)


@jax.jit
def rcu_fwd(x, p):
    t = jnp.maximum(x, 0.0)
    t = apply_conv(t, p["w1"], relu=True)     # ReLU fused in matmul epilogue
    t = apply_conv(t, p["w2"])
    return x + t


@jax.jit
def crp_fwd(x, ws):
    ret = jnp.maximum(x, 0.0)
    fin = ret
    for w in ws:
        fin = apply_conv(_maxpool(fin, 5, 1, 2), w)
        ret = ret + fin
    return ret


@jax.jit
def mrf_fwd(hr, lr, p):
    a = apply_conv(hr, p["hr"]).astype(jnp.float32)
    b = upsample2x_bilinear(apply_conv(lr, p["lr"]))
    return (a + b).astype(jnp.bfloat16)


@jax.jit
def head_fwd(x, pc, bias):
    y = apply_conv(x, pc, out_dtype=jnp.float32) + bias[None, None, None, :]
    return jnp.transpose(y, (0, 3, 1, 2))     # NHWC -> NCHW


# -----------------------------------------------------------------------------
# Deterministic parameter construction (xavier_normal, gain = sqrt(2)),
# weights quantized + packed at build time.
# -----------------------------------------------------------------------------
class ParamFactory:
    def __init__(self, seed=0):
        self._key = jax.random.PRNGKey(seed)

    def _next(self):
        self._key, sub = jax.random.split(self._key)
        return sub

    def conv(self, cout, cin, kh, kw, stride=1, padding=0):
        fan_in = cin * kh * kw
        fan_out = cout * kh * kw
        std = math.sqrt(2.0) * math.sqrt(2.0 / (fan_in + fan_out))
        w = jax.random.normal(self._next(), (cout, cin, kh, kw),
                              jnp.float32) * std
        K = kh * kw * cin
        Kp = _round_up(K, 128)
        Np = _round_up(cout, 128)
        wm = jnp.transpose(w, (2, 3, 1, 0)).reshape(K, cout)   # (kh,kw,cin,cout)
        # per-output-channel symmetric int8 quantization
        amax = jnp.max(jnp.abs(wm), axis=0)
        scale = jnp.where(amax > 0, amax / 127.0, 1.0)
        q = jnp.clip(jnp.round(wm / scale[None, :]), -127, 127).astype(jnp.int8)
        packed = jnp.zeros((Kp, Np), jnp.int8).at[:K, :cout].set(q)
        scale_p = jnp.zeros((1, Np), jnp.float32).at[0, :cout].set(scale)
        return PackedConv(packed, scale_p, kh, kw, cin, cout, stride, padding)


def make_bottleneck(pf, in_ch, inner, stride, downsample):
    p = {
        "conv1": pf.conv(inner, in_ch, 1, 1, stride=1, padding=0),
        "conv2": pf.conv(inner, inner, 3, 3, stride=stride, padding=1),
        # NOTE: reference module really uses a 3x3 conv here (non-standard).
        "conv3": pf.conv(inner * 4, inner, 3, 3, stride=1, padding=1),
    }
    if downsample:
        p["ds"] = pf.conv(inner * 4, in_ch, 1, 1, stride=stride, padding=0)
    return p


def make_layer(pf, state, n_channels, n_blocks, stride):
    in_ch = state["in_channels"]
    downsample = (stride != 1) or (in_ch != n_channels * 4)
    blocks = [make_bottleneck(pf, in_ch, n_channels, stride, downsample)]
    in_ch = n_channels * 4
    for _ in range(1, n_blocks):
        blocks.append(make_bottleneck(pf, in_ch, n_channels, 1, False))
    state["in_channels"] = in_ch
    return blocks


def make_rcu(pf, in_ch, conv_ch):
    return {"w1": pf.conv(conv_ch, in_ch, 3, 3, padding=1),
            "w2": pf.conv(in_ch, conv_ch, 3, 3, padding=1)}


def make_crp(pf, in_ch, n=2):
    return [pf.conv(in_ch, in_ch, 3, 3, padding=1) for _ in range(n)]


def make_mrf(pf, hr_ch, lr_ch):
    return {"hr": pf.conv(hr_ch, hr_ch, 3, 3, padding=1),
            "lr": pf.conv(hr_ch, lr_ch, 3, 3, padding=1)}


def make_refine_block(pf, hr_ch, lr_ch, idx):
    cc = 512 if idx == 4 else 256
    p = {"idx": idx,
         "hr_2rcu": [make_rcu(pf, hr_ch, cc), make_rcu(pf, hr_ch, cc)]}
    if idx != 4:
        p["lr_2rcu"] = [make_rcu(pf, lr_ch, 256), make_rcu(pf, lr_ch, 256)]
        p["mrf"] = make_mrf(pf, hr_ch, lr_ch)
    p["crp"] = make_crp(pf, hr_ch, 2)
    if idx == 1:
        p["out"] = [make_rcu(pf, hr_ch, 256) for _ in range(3)]
    else:
        p["out"] = [make_rcu(pf, hr_ch, 256)]
    return p


def refine_block_fwd(hr, lr, p):
    if p["idx"] != 4:
        for r in p["hr_2rcu"]:
            hr = rcu_fwd(hr, r)
        for r in p["lr_2rcu"]:
            lr = rcu_fwd(lr, r)
        feat = mrf_fwd(hr, lr, p["mrf"])
    else:
        feat = hr
        for r in p["hr_2rcu"]:
            feat = rcu_fwd(feat, r)
    feat = crp_fwd(feat, p["crp"])
    for r in p["out"]:
        feat = rcu_fwd(feat, r)
    return feat


def make_refinenet_resnet152(seed=0, num_class=2):
    pf = ParamFactory(seed)
    state = {"in_channels": 64}
    params = {
        "proc_conv": pf.conv(64, 1, 7, 7, stride=2, padding=3),
        "layer1": make_layer(pf, state, 64, 3, 1),
        "layer2": make_layer(pf, state, 128, 8, 2),
        "layer3": make_layer(pf, state, 256, 36, 2),
        "layer4": make_layer(pf, state, 512, 3, 2),
    }
    params["block4"] = make_refine_block(pf, 2048, None, 4)
    params["block3"] = make_refine_block(pf, 1024, 2048, 3)
    params["block2"] = make_refine_block(pf, 512, 1024, 2)
    params["block1"] = make_refine_block(pf, 256, 512, 1)
    params["out_conv"] = pf.conv(num_class, 256, 1, 1)
    params["out_b"] = jnp.zeros((num_class,), jnp.float32)  # init.constant_(0)
    return params


def refinenet_forward(params, images_nchw):
    # resnet_proc + maxpool
    f4 = stem_fwd(images_nchw, params["proc_conv"])
    for b in params["layer1"]:
        f4 = bottleneck_fwd(f4, b)
    f8 = f4
    for b in params["layer2"]:
        f8 = bottleneck_fwd(f8, b)
    f16 = f8
    for b in params["layer3"]:
        f16 = bottleneck_fwd(f16, b)
    f32 = f16
    for b in params["layer4"]:
        f32 = bottleneck_fwd(f32, b)
    # RefineNet decoder
    inner = refine_block_fwd(f32, None, params["block4"])
    inner = refine_block_fwd(f16, inner, params["block3"])
    inner = refine_block_fwd(f8, inner, params["block2"])
    inner = refine_block_fwd(f4, inner, params["block1"])
    return head_fwd(inner, params["out_conv"], params["out_b"])


if __name__ == "__main__":
    key = jax.random.PRNGKey(0)
    # Small input consistent with the module: NCHW, 1 input channel, 64x64
    # (spatial must survive the /32 downsampling of the ResNet trunk).
    images = jax.random.normal(key, (1, 1, 64, 64), jnp.float32)
    params = make_refinenet_resnet152(seed=0, num_class=2)
    out = refinenet_forward(params, images)
    out = jax.block_until_ready(out)
    assert out.shape == (1, 2, 16, 16), out.shape
    assert bool(jnp.all(jnp.isfinite(out)))
    print("KERNEL_OK")
</pallas_src>

<mosaic_0001>
module attributes {stable_mosaic.version = 11 : i64} {
  func.func @_mm_kernel(%arg0: i32, %arg1: i32, %arg2: i32, %arg3: memref<512x128xbf16, #tpu.memory_space<vmem>>, %arg4: memref<128x128xi8, #tpu.memory_space<vmem>>, %arg5: memref<1x128xf32, #tpu.memory_space<vmem>>, %arg6: memref<512x128xbf16, #tpu.memory_space<vmem>>, %arg7: memref<512x128xf32, #tpu.memory_space<vmem>>) attributes {dimension_semantics = [#tpu.dimension_semantics<parallel>, #tpu.dimension_semantics<parallel>, #tpu.dimension_semantics<arbitrary>], iteration_bounds = array<i64: 2, 1, 1>, scalar_prefetch = 0 : i64, scratch_operands = 1 : i64, tpu.core_type = #tpu.core_type<tc>, window_params = [{transform_indices = @transform_0, window_bounds = array<i64: 512, 128>}, {transform_indices = @transform_1, window_bounds = array<i64: 128, 128>}, {transform_indices = @transform_2, window_bounds = array<i64: 1, 128>}, {transform_indices = @transform_3, window_bounds = array<i64: 512, 128>}]} {
    %c0_i32 = arith.constant 0 : i32
    %0 = arith.cmpi eq, %arg2, %c0_i32 : i32
    %1 = arith.extui %0 : i1 to i32
    %c0_i32_0 = arith.constant 0 : i32
    %2 = arith.cmpi ne, %1, %c0_i32_0 : i32
    scf.if %2 {
      %cst_10 = arith.constant 0.000000e+00 : f32
      %13 = vector.broadcast %cst_10 : f32 to vector<512x128xf32>
      %c0_11 = arith.constant 0 : index
      %c0_12 = arith.constant 0 : index
      %14 = vector.load %arg7[%c0_11, %c0_12] : memref<512x128xf32, #tpu.memory_space<vmem>>, vector<512x128xf32>
      tpu.vector_store %arg7[%c0_11, %c0_12], %13 {strides = array<i32>} : memref<512x128xf32, #tpu.memory_space<vmem>>, vector<512x128xf32>,
    } else {
    }
    %c0 = arith.constant 0 : index
    %c0_1 = arith.constant 0 : index
    %3 = vector.load %arg7[%c0, %c0_1] : memref<512x128xf32, #tpu.memory_space<vmem>>, vector<512x128xf32>
    %c0_2 = arith.constant 0 : index
    %c0_3 = arith.constant 0 : index
    %4 = vector.load %arg3[%c0_2, %c0_3] : memref<512x128xbf16, #tpu.memory_space<vmem>>, vector<512x128xbf16>
    %c0_4 = arith.constant 0 : index
    %c0_5 = arith.constant 0 : index
    %5 = vector.load %arg4[%c0_4, %c0_5] : memref<128x128xi8, #tpu.memory_space<vmem>>, vector<128x128xi8>
    %6 = arith.sitofp %5 : vector<128x128xi8> to vector<128x128xbf16>
    %cst = arith.constant dense<0.000000e+00> : vector<512x128xf32>
    %7 = tpu.matmul %4, %6, %cst {dimension_numbers = #tpu.dot_dimension_numbers<[1], [0], [0], [1], [0, 0, 1, 1], [], []>} : vector<512x128xbf16>, vector<128x128xbf16>, vector<512x128xf32> -> vector<512x128xf32>
    %8 = arith.addf %3, %7 : vector<512x128xf32>
    %c0_6 = arith.constant 0 : index
    %c0_7 = arith.constant 0 : index
    %9 = vector.load %arg7[%c0_6, %c0_7] : memref<512x128xf32, #tpu.memory_space<vmem>>, vector<512x128xf32>
    tpu.vector_store %arg7[%c0_6, %c0_7], %8 {strides = array<i32>} : memref<512x128xf32, #tpu.memory_space<vmem>>, vector<512x128xf32>,
    %c0_i32_8 = arith.constant 0 : i32
    %10 = arith.cmpi eq, %arg2, %c0_i32_8 : i32
    %11 = arith.extui %10 : i1 to i32
    %c0_i32_9 = arith.constant 0 : i32
    %12 = arith.cmpi ne, %11, %c0_i32_9 : i32
    scf.if %12 {
      %c0_10 = arith.constant 0 : index
      %c0_11 = arith.constant 0 : index
      %13 = vector.load %arg7[%c0_10, %c0_11] : memref<512x128xf32, #tpu.memory_space<vmem>>, vector<512x128xf32>
      %c0_12 = arith.constant 0 : index
      %c0_13 = arith.constant 0 : index
      %14 = vector.load %arg5[%c0_12, %c0_13] : memref<1x128xf32, #tpu.memory_space<vmem>>, vector<1x128xf32>
      %15 = vector.broadcast %14 : vector<1x128xf32> to vector<512x128xf32>
      %16 = arith.mulf %13, %15 : vector<512x128xf32>
      %17 = arith.truncf %16 : vector<512x128xf32> to vector<512x128xbf16>
      %c0_14 = arith.constant 0 : index
      %c0_15 = arith.constant 0 : index
      %18 = vector.load %arg6[%c0_14, %c0_15] : memref<512x128xbf16, #tpu.memory_space<vmem>>, vector<512x128xbf16>
      tpu.vector_store %arg6[%c0_14, %c0_15], %17 {strides = array<i32>} : memref<512x128xbf16, #tpu.memory_space<vmem>>, vector<512x128xbf16>,
    } else {
    }
    return
  }
  func.func @transform_0(%arg0: i32, %arg1: i32, %arg2: i32) -> (i32, i32) {
    %c0_i32 = arith.constant 0 : i32
    return %arg0, %arg2 : i32, i32
  }
  func.func @transform_1(%arg0: i32, %arg1: i32, %arg2: i32) -> (i32, i32) {
    %c0_i32 = arith.constant 0 : i32
    return %arg2, %arg1 : i32, i32
  }
  func.func @transform_2(%arg0: i32, %arg1: i32, %arg2: i32) -> (i32, i32) {
    %c0_i32 = arith.constant 0 : i32
    %c0_i32_0 = arith.constant 0 : i32
    return %c0_i32, %arg1 : i32, i32
  }
  func.func @transform_3(%arg0: i32, %arg1: i32, %arg2: i32) -> (i32, i32) {
    %c0_i32 = arith.constant 0 : i32
    return %arg0, %arg1 : i32, i32
  }
}

</mosaic_0001>

<bundles_post_ra>
// kernel: stem_fwd.1
= control target key start
LH: loop header
LB: loop body
LE: loop exit
PB: predicated region body
PF: predicated region fallthrough
CT: control target
= control target key end

     0   :  { %s1819_s12 = smov 0   ;;  %s1821_s13 = smov 0   ;;  %s2011_s0 = inlined_call_operand.vmem [shape: bf16[1024,128], index: 0, kind: input, shape index: {}]   ;;  %s2012_s1 = inlined_call_operand.vmem [shape: s8[128,128], index: 1, kind: input, shape index: {}]   ;;  %s2013_s2 = inlined_call_operand.vmem [shape: f32[1,128], index: 2, kind: input, shape index: {}]   ;;  %s2014_s3 = inlined_call_operand.vmem [shape: bf16[1024,128], index: 3, kind: output, shape index: {}]  }
   0x1   :  { %s1823_s14 = smov 0  }
   0x2 LB: > { %s32_s15 = sadd.s32 1, %s1793_s13  ;;  %p1368_p0 = scmp.ge.s32.totalorder %s1797_s14, 1  ;;  %s1797_s14 = sphi %s1823_s14, %s13_s14   ;;  %s1793_s13 = sphi %s1821_s13, %s2016_s13   ;;  %s1789_s12 = sphi %s1819_s12, %s2015_s12  }
   0x3   : > { %p34_p1 = scmp.ge.s32.totalorder %s32_s15, 2  ;;  %p188_p2 = scmp.lt.s32.totalorder %s1797_s14, 3 }
   0x5   : > { %s2018_s15 = smov (%p34_p1, %s32_s15), 0  ;;  %p189_p3 = pnand %p1368_p0, %p188_p2 }
   0x6   : > { %s1369_s24 = sshll.u32 (!%p189_p3), %s1789_s12, 6 }
   0x7   : > { %192 = sbr.rel (%p189_p3) target bundleno = 309 (0x135), region = 32  ;;  %p230_p4 = scmp.lt.s32.totalorder (!%p189_p3), %s1369_s24, 127 }
   0xc   : > { %v458_v0 = vld [vmem:[%s2012_s1 + $0x18] sm:$0xff]  ;;  %v457_v1 = vld [vmem:[%s2012_s1 + $0x10] sm:$0xff]  ;;  %v456_v18 = vld [vmem:[%s2012_s1 + $0x8] sm:$0xff]  ;;  %s2020_s24 = smov (!%p230_p4, %s1369_s24), 127 }
   0xd   : > { %v473_v2 = vunpack.c.2.s8 %v458_v0  ;;  %v474_v3 = vunpack.c.3.s8 %v458_v0  ;;  %v471_v4 = vunpack.c.0.s8 %v458_v0  ;;  %v472_v5 = vunpack.c.1.s8 %v458_v0  ;;  %v455_v29 = vld [vmem:[%s2012_s1] sm:$0xff]  ;;  %s1370_s25 = sshll.u32 %s2020_s24, 2 }
   0xe   : > { %v469_v6 = vunpack.c.2.s8 %v457_v1  ;;  %v470_v7 = vunpack.c.3.s8 %v457_v1  ;;  %v467_v13 = vunpack.c.0.s8 %v457_v1  ;;  %v468_v14 = vunpack.c.1.s8 %v457_v1  ;;  %s1860_s28 = scalar_lea.vmem %s2011_s0, %s1370_s25  ;;  %s1908_s6 = scalar_lea.vmem %s2014_s3, %s1370_s25 }
   0xf   : > { %v489_v8 = vcvt.s32.f32 %v473_v2  ;;  %v490_v9 = vcvt.s32.f32 %v474_v3  ;;  %v487_v10 = vcvt.s32.f32 %v471_v4  ;;  %v488_v11 = vcvt.s32.f32 %v472_v5  ;;  %v1503_v44 = vld [vmem:[%s1860_s28] sm:$0xff]  ;;  %v1504_v48 = vld [vmem:[%s1860_s28 + $0x8] sm:$0xff]  ;;  %v1505_v52 = vld [vmem:[%s1860_s28 + $0x10] sm:$0xff] }
  0x10   : > { %v485_v16 = vcvt.s32.f32 %v469_v6  ;;  %v486_v17 = vcvt.s32.f32 %v470_v7  ;;  %v483_v19 = vcvt.s32.f32 %v467_v13  ;;  %v484_v20 = vcvt.s32.f32 %v468_v14  ;;  %v1511_v45 = vld [vmem:[%s1860_s28 + $0x40] sm:$0xff]  ;;  %v1512_v49 = vld [vmem:[%s1860_s28 + $0x48] sm:$0xff]  ;;  %v1513_v53 = vld [vmem:[%s1860_s28 + $0x50] sm:$0xff] }
  0x11   : > { %v498_v12 = vpack.c.bf16 %v490_v9, %v489_v8  ;;  %v497_v15 = vpack.c.bf16 %v488_v11, %v487_v10  ;;  %v465_v22 = vunpack.c.2.s8 %v456_v18  ;;  %v466_v23 = vunpack.c.3.s8 %v456_v18  ;;  %v1519_v46 = vld [vmem:[%s1860_s28 + $0x80] sm:$0xff]  ;;  %v1520_v50 = vld [vmem:[%s1860_s28 + $0x88] sm:$0xff]  ;;  %v1521_v54 = vld [vmem:[%s1860_s28 + $0x90] sm:$0xff] }
  0x12   : > { %v496_v21 = vpack.c.bf16 %v486_v17, %v485_v16  ;;  %v495_v24 = vpack.c.bf16 %v484_v20, %v483_v19  ;;  %v463_v27 = vunpack.c.0.s8 %v456_v18  ;;  %v464_v28 = vunpack.c.1.s8 %v456_v18  ;;  %v1527_v47 = vld [vmem:[%s1860_s28 + $0xc0] sm:$0xff]  ;;  %v1528_v51 = vld [vmem:[%s1860_s28 + $0xc8] sm:$0xff]  ;;  %v1529_v55 = vld [vmem:[%s1860_s28 + $0xd0] sm:$0xff] }
  0x13   : > { %691 = vmatpush.bf16.msra.mxu0 %v498_v12  ;;  %1726 = vmatpush.bf16.msra.mxu1 %v498_v12  ;;  %v481_v25 = vcvt.s32.f32 %v465_v22  ;;  %v482_v26 = vcvt.s32.f32 %v466_v23  ;;  %v461_v30 = vunpack.c.2.s8 %v455_v29  ;;  %v462_v34 = vunpack.c.3.s8 %v455_v29  ;;  %v1506_v56 = vld [vmem:[%s1860_s28 + $0x18] sm:$0xff]  ;;  %v1507_v60 = vld [vmem:[%s1860_s28 + $0x20] sm:$0xff]  ;;  %v1508_v0 = vld [vmem:[%s1860_s28 + $0x28] sm:$0xff] }
  0x14   : > { %1727 = vmatpush.bf16.msra.mxu2 %v498_v12  ;;  %1728 = vmatpush.bf16.msra.mxu3 %v498_v12  ;;  %v479_v32 = vcvt.s32.f32 %v463_v27  ;;  %v480_v33 = vcvt.s32.f32 %v464_v28  ;;  %v459_v35 = vunpack.c.0.s8 %v455_v29  ;;  %v460_v39 = vunpack.c.1.s8 %v455_v29  ;;  %v1514_v57 = vld [vmem:[%s1860_s28 + $0x58] sm:$0xff]  ;;  %v1515_v61 = vld [vmem:[%s1860_s28 + $0x60] sm:$0xff]  ;;  %v1516_v1 = vld [vmem:[%s1860_s28 + $0x68] sm:$0xff] }
  0x15   : > { %v494_v31 = vpack.c.bf16 %v482_v26, %v481_v25  ;;  %v477_v37 = vcvt.s32.f32 %v461_v30  ;;  %v478_v38 = vcvt.s32.f32 %v462_v34  ;;  %v1522_v58 = vld [vmem:[%s1860_s28 + $0x98] sm:$0xff]  ;;  %v1523_v62 = vld [vmem:[%s1860_s28 + $0xa0] sm:$0xff]  ;;  %v1524_v2 = vld [vmem:[%s1860_s28 + $0xa8] sm:$0xff] }
  0x16   : > { %v493_v36 = vpack.c.bf16 %v480_v33, %v479_v32  ;;  %v475_v41 = vcvt.s32.f32 %v459_v35  ;;  %v476_v42 = vcvt.s32.f32 %v460_v39  ;;  %v1530_v59 = vld [vmem:[%s1860_s28 + $0xd8] sm:$0xff]  ;;  %v1531_v63 = vld [vmem:[%s1860_s28 + $0xe0] sm:$0xff]  ;;  %v1532_v3 = vld [vmem:[%s1860_s28 + $0xe8] sm:$0xff] }
  0x17   : > { %692 = vmatpush.bf16.msra.mxu0 %v497_v15  ;;  %1729 = vmatpush.bf16.msra.mxu1 %v497_v15  ;;  %v492_v40 = vpack.c.bf16 %v478_v38, %v477_v37  ;;  %v1509_v4 = vld [vmem:[%s1860_s28 + $0x30] sm:$0xff]  ;;  %v1510_v8 = vld [vmem:[%s1860_s28 + $0x38] sm:$0xff]  ;;  %v1897_v14 = vld [vmem:[%s2013_s2] ss:$0 sm:$0xff] }
  0x18   : > { %1730 = vmatpush.bf16.msra.mxu2 %v497_v15  ;;  %1731 = vmatpush.bf16.msra.mxu3 %v497_v15  ;;  %v491_v43 = vpack.c.bf16 %v476_v42, %v475_v41  ;;  %v1517_v5 = vld [vmem:[%s1860_s28 + $0x70] sm:$0xff]  ;;  %v1518_v9 = vld [vmem:[%s1860_s28 + $0x78] sm:$0xff] }
  0x19   : > { %v1525_v6 = vld [vmem:[%s1860_s28 + $0xb0] sm:$0xff]  ;;  %v1526_v10 = vld [vmem:[%s1860_s28 + $0xb8] sm:$0xff] }
  0x1a   : > { %v1533_v7 = vld [vmem:[%s1860_s28 + $0xf0] sm:$0xff]  ;;  %v1534_v11 = vld [vmem:[%s1860_s28 + $0xf8] sm:$0xff] }
  0x1b   : > { %693 = vmatpush.bf16.msra.mxu0 %v496_v21  ;;  %1732 = vmatpush.bf16.msra.mxu1 %v496_v21 }
  0x1c   : > { %1733 = vmatpush.bf16.msra.mxu2 %v496_v21  ;;  %1734 = vmatpush.bf16.msra.mxu3 %v496_v21 }
  0x1f   : > { %694 = vmatpush.bf16.msra.mxu0 %v495_v24  ;;  %1735 = vmatpush.bf16.msra.mxu1 %v495_v24 }
  0x20   : > { %1736 = vmatpush.bf16.msra.mxu2 %v495_v24  ;;  %1737 = vmatpush.bf16.msra.mxu3 %v495_v24 }
  0x23   : > { %695 = vmatpush.bf16.msra.mxu0 %v494_v31  ;;  %1738 = vmatpush.bf16.msra.mxu1 %v494_v31 }
  0x24   : > { %1739 = vmatpush.bf16.msra.mxu2 %v494_v31  ;;  %1740 = vmatpush.bf16.msra.mxu3 %v494_v31 }
  0x27   : > { %696 = vmatpush.bf16.msra.mxu0 %v493_v36  ;;  %1741 = vmatpush.bf16.msra.mxu1 %v493_v36 }
  0x28   : > { %1742 = vmatpush.bf16.msra.mxu2 %v493_v36  ;;  %1743 = vmatpush.bf16.msra.mxu3 %v493_v36 }
  0x2b   : > { %697 = vmatpush.bf16.msra.mxu0 %v492_v40  ;;  %1744 = vmatpush.bf16.msra.mxu1 %v492_v40 }
  0x2c   : > { %1745 = vmatpush.bf16.msra.mxu2 %v492_v40  ;;  %1746 = vmatpush.bf16.msra.mxu3 %v492_v40 }
  0x2f   : > { %698 = vmatpush.bf16.msra.mxu0 %v491_v43  ;;  %1747 = vmatpush.bf16.msra.mxu1 %v491_v43 }
  0x30   : > { %1748 = vmatpush.bf16.msra.mxu2 %v491_v43  ;;  %1749 = vmatpush.bf16.msra.mxu3 %v491_v43 }
  0x32   : > { %699 = vmatmul.bf16.vlgmr.msra.gmra.mxu0 %v1503_v44  ;;  %739 = vmatmul.bf16.vlgmr.msra.gmra.mxu1 %v1511_v45 }
  0x33   : > { %779 = vmatmul.bf16.vlgmr.msra.gmra.mxu2 %v1519_v46  ;;  %819 = vmatmul.bf16.vlgmr.msra.gmra.mxu3 %v1527_v47 }
  0x42   : > { %704 = vmatmul.bf16.gmra.mxu0 %v1504_v48  ;;  %744 = vmatmul.bf16.gmra.mxu1 %v1512_v49 }
  0x43   : > { %784 = vmatmul.bf16.gmra.mxu2 %v1520_v50  ;;  %824 = vmatmul.bf16.gmra.mxu3 %v1528_v51 }
  0x52   : > { %709 = vmatmul.bf16.gmra.mxu0 %v1505_v52  ;;  %749 = vmatmul.bf16.gmra.mxu1 %v1513_v53 }
  0x53   : > { %789 = vmatmul.bf16.gmra.mxu2 %v1521_v54  ;;  %829 = vmatmul.bf16.gmra.mxu3 %v1529_v55 }
  0x62   : > { %714 = vmatmul.bf16.gmra.mxu0 %v1506_v56  ;;  %754 = vmatmul.bf16.gmra.mxu1 %v1514_v57 }
  0x63   : > { %794 = vmatmul.bf16.gmra.mxu2 %v1522_v58  ;;  %834 = vmatmul.bf16.gmra.mxu3 %v1530_v59 }
  0x72   : > { %719 = vmatmul.bf16.gmra.mxu0 %v1507_v60  ;;  %759 = vmatmul.bf16.gmra.mxu1 %v1515_v61 }
  0x73   : > { %799 = vmatmul.bf16.gmra.mxu2 %v1523_v62  ;;  %839 = vmatmul.bf16.gmra.mxu3 %v1531_v63 }
  0x82   : > { %724 = vmatmul.bf16.gmra.mxu0 %v1508_v0  ;;  %764 = vmatmul.bf16.gmra.mxu1 %v1516_v1 }
  0x83   : > { %804 = vmatmul.bf16.gmra.mxu2 %v1524_v2  ;;  %844 = vmatmul.bf16.gmra.mxu3 %v1532_v3 }
  0x92   : > { %729 = vmatmul.bf16.gmra.mxu0 %v1509_v4  ;;  %769 = vmatmul.bf16.gmra.mxu1 %v1517_v5 }
  0x93   : > { %809 = vmatmul.bf16.gmra.mxu2 %v1525_v6  ;;  %849 = vmatmul.bf16.gmra.mxu3 %v1533_v7 }
  0xa2   : > { %734 = vmatmul.bf16.gmra.mxu0 %v1510_v8  ;;  %774 = vmatmul.bf16.gmra.mxu1 %v1518_v9 }
  0xa3   : > { %814 = vmatmul.bf16.gmra.mxu2 %v1526_v10  ;;  %854 = vmatmul.bf16.gmra.mxu3 %v1534_v11 }
  0xaf   : > { %v700_v12 = vpop.f32.mrf.mxu0  ;;  %v740_v13 = vpop.f32.mrf.mxu1 }
  0xb0   : > { %v1059_v19 = vmul.f32 %v1897_v14, %v700_v12  ;;  %v1075_v20 = vmul.f32 %v1897_v14, %v740_v13 }
  0xb6   : > { %v780_v15 = vpop.f32.mrf.mxu2  ;;  %v820_v16 = vpop.f32.mrf.mxu3 }
  0xb7   : > { %v702_v17 = vpop.f32.mrf.mxu0  ;;  %v742_v18 = vpop.f32.mrf.mxu1  ;;  %v1091_v27 = vmul.f32 %v1897_v14, %v780_v15  ;;  %v1107_v28 = vmul.f32 %v1897_v14, %v820_v16 }
  0xb8   : > { %v1060_v21 = vmul.f32 %v1897_v14, %v702_v17  ;;  %v1076_v22 = vmul.f32 %v1897_v14, %v742_v18 }
  0xba   : > { %v1538_v23 = vpack.c.bf16 %v1060_v21, %v1059_v19  ;;  %v1578_v24 = vpack.c.bf16 %v1076_v22, %v1075_v20 }
  0xbc   : > { %1539 = vst [vmem:[%s1908_s6] sm:$0xff] %v1538_v23  }
  0xbd   : > { %1702 = vst [vmem:[%s1908_s6 + $0x40] sm:$0xff] %v1578_v24  }
  0xbe   : > { %v782_v25 = vpop.f32.mrf.mxu2  ;;  %v822_v26 = vpop.f32.mrf.mxu3 }
  0xbf   : > { %v1092_v29 = vmul.f32 %v1897_v14, %v782_v25  ;;  %v1108_v30 = vmul.f32 %v1897_v14, %v822_v26  ;;  %v705_v31 = vpop.f32.mrf.mxu0  ;;  %v745_v32 = vpop.f32.mrf.mxu1 }
  0xc0   : > { %v1061_v39 = vmul.f32 %v1897_v14, %v705_v31  ;;  %v1077_v40 = vmul.f32 %v1897_v14, %v745_v32 }
  0xc1   : > { %v1618_v33 = vpack.c.bf16 %v1092_v29, %v1091_v27  ;;  %v1658_v34 = vpack.c.bf16 %v1108_v30, %v1107_v28 }
  0xc3   : > { %1710 = vst [vmem:[%s1908_s6 + $0x80] sm:$0xff] %v1618_v33  }
  0xc4   : > { %1718 = vst [vmem:[%s1908_s6 + $0xc0] sm:$0xff] %v1658_v34  }
  0xc6   : > { %v785_v35 = vpop.f32.mrf.mxu2  ;;  %v825_v36 = vpop.f32.mrf.mxu3 }
  0xc7   : > { %v707_v37 = vpop.f32.mrf.mxu0  ;;  %v747_v38 = vpop.f32.mrf.mxu1  ;;  %v1093_v47 = vmul.f32 %v1897_v14, %v785_v35  ;;  %v1109_v48 = vmul.f32 %v1897_v14, %v825_v36 }
  0xc8   : > { %v1062_v41 = vmul.f32 %v1897_v14, %v707_v37  ;;  %v1078_v42 = vmul.f32 %v1897_v14, %v747_v38 }
  0xca   : > { %v1543_v43 = vpack.c.bf16 %v1062_v41, %v1061_v39  ;;  %v1583_v44 = vpack.c.bf16 %v1078_v42, %v1077_v40 }
  0xcc   : > { %1695 = vst [vmem:[%s1908_s6 + $0x8] sm:$0xff] %v1543_v43  }
  0xcd   : > { %1703 = vst [vmem:[%s1908_s6 + $0x48] sm:$0xff] %v1583_v44  }
  0xce   : > { %v787_v45 = vpop.f32.mrf.mxu2  ;;  %v827_v46 = vpop.f32.mrf.mxu3 }
  0xcf   : > { %v1094_v49 = vmul.f32 %v1897_v14, %v787_v45  ;;  %v1110_v50 = vmul.f32 %v1897_v14, %v827_v46  ;;  %v710_v51 = vpop.f32.mrf.mxu0  ;;  %v750_v52 = vpop.f32.mrf.mxu1 }
  0xd0   : > { %v1063_v59 = vmul.f32 %v1897_v14, %v710_v51  ;;  %v1079_v60 = vmul.f32 %v1897_v14, %v750_v52 }
  0xd1   : > { %v1623_v53 = vpack.c.bf16 %v1094_v49, %v1093_v47  ;;  %v1663_v54 = vpack.c.bf16 %v1110_v50, %v1109_v48 }
  0xd3   : > { %1711 = vst [vmem:[%s1908_s6 + $0x88] sm:$0xff] %v1623_v53  }
  0xd4   : > { %1719 = vst [vmem:[%s1908_s6 + $0xc8] sm:$0xff] %v1663_v54  }
  0xd6   : > { %v790_v55 = vpop.f32.mrf.mxu2  ;;  %v830_v56 = vpop.f32.mrf.mxu3 }
  0xd7   : > { %v712_v57 = vpop.f32.mrf.mxu0  ;;  %v752_v58 = vpop.f32.mrf.mxu1  ;;  %v1095_v3 = vmul.f32 %v1897_v14, %v790_v55  ;;  %v1111_v4 = vmul.f32 %v1897_v14, %v830_v56 }
  0xd8   : > { %v1064_v61 = vmul.f32 %v1897_v14, %v712_v57  ;;  %v1080_v62 = vmul.f32 %v1897_v14, %v752_v58 }
  0xda   : > { %v1548_v63 = vpack.c.bf16 %v1064_v61, %v1063_v59  ;;  %v1588_v0 = vpack.c.bf16 %v1080_v62, %v1079_v60 }
  0xdc   : > { %1696 = vst [vmem:[%s1908_s6 + $0x10] sm:$0xff] %v1548_v63  }
  0xdd   : > { %1704 = vst [vmem:[%s1908_s6 + $0x50] sm:$0xff] %v1588_v0  }
  0xde   : > { %v792_v1 = vpop.f32.mrf.mxu2  ;;  %v832_v2 = vpop.f32.mrf.mxu3 }
  0xdf   : > { %v1096_v5 = vmul.f32 %v1897_v14, %v792_v1  ;;  %v1112_v6 = vmul.f32 %v1897_v14, %v832_v2  ;;  %v715_v7 = vpop.f32.mrf.mxu0  ;;  %v755_v8 = vpop.f32.mrf.mxu1 }
  0xe0   : > { %v1065_v16 = vmul.f32 %v1897_v14, %v715_v7  ;;  %v1081_v17 = vmul.f32 %v1897_v14, %v755_v8 }
  0xe1   : > { %v1628_v9 = vpack.c.bf16 %v1096_v5, %v1095_v3  ;;  %v1668_v10 = vpack.c.bf16 %v1112_v6, %v1111_v4 }
  0xe3   : > { %1712 = vst [vmem:[%s1908_s6 + $0x90] sm:$0xff] %v1628_v9  }
  0xe4   : > { %1720 = vst [vmem:[%s1908_s6 + $0xd0] sm:$0xff] %v1668_v10  }
  0xe6   : > { %v795_v11 = vpop.f32.mrf.mxu2  ;;  %v835_v12 = vpop.f32.mrf.mxu3 }
  0xe7   : > { %v717_v13 = vpop.f32.mrf.mxu0  ;;  %v757_v15 = vpop.f32.mrf.mxu1  ;;  %v1097_v24 = vmul.f32 %v1897_v14, %v795_v11  ;;  %v1113_v25 = vmul.f32 %v1897_v14, %v835_v12 }
  0xe8   : > { %v1066_v18 = vmul.f32 %v1897_v14, %v717_v13  ;;  %v1082_v19 = vmul.f32 %v1897_v14, %v757_v15 }
  0xea   : > { %v1553_v20 = vpack.c.bf16 %v1066_v18, %v1065_v16  ;;  %v1593_v21 = vpack.c.bf16 %v1082_v19, %v1081_v17 }
  0xec   : > { %1697 = vst [vmem:[%s1908_s6 + $0x18] sm:$0xff] %v1553_v20  }
  0xed   : > { %1705 = vst [vmem:[%s1908_s6 + $0x58] sm:$0xff] %v1593_v21  }
  0xee   : > { %v797_v22 = vpop.f32.mrf.mxu2  ;;  %v837_v23 = vpop.f32.mrf.mxu3 }
  0xef   : > { %v1098_v26 = vmul.f32 %v1897_v14, %v797_v22  ;;  %v1114_v27 = vmul.f32 %v1897_v14, %v837_v23  ;;  %v720_v28 = vpop.f32.mrf.mxu0  ;;  %v760_v29 = vpop.f32.mrf.mxu1 }
  0xf0   : > { %v1067_v36 = vmul.f32 %v1897_v14, %v720_v28  ;;  %v1083_v37 = vmul.f32 %v1897_v14, %v760_v29 }
  0xf1   : > { %v1633_v30 = vpack.c.bf16 %v1098_v26, %v1097_v24  ;;  %v1673_v31 = vpack.c.bf16 %v1114_v27, %v1113_v25 }
  0xf3   : > { %1713 = vst [vmem:[%s1908_s6 + $0x98] sm:$0xff] %v1633_v30  }
  0xf4   : > { %1721 = vst [vmem:[%s1908_s6 + $0xd8] sm:$0xff] %v1673_v31  }
  0xf6   : > { %v800_v32 = vpop.f32.mrf.mxu2  ;;  %v840_v33 = vpop.f32.mrf.mxu3 }
  0xf7   : > { %v722_v34 = vpop.f32.mrf.mxu0  ;;  %v762_v35 = vpop.f32.mrf.mxu1  ;;  %v1099_v44 = vmul.f32 %v1897_v14, %v800_v32  ;;  %v1115_v45 = vmul.f32 %v1897_v14, %v840_v33 }
  0xf8   : > { %v1068_v38 = vmul.f32 %v1897_v14, %v722_v34  ;;  %v1084_v39 = vmul.f32 %v1897_v14, %v762_v35 }
  0xfa   : > { %v1558_v40 = vpack.c.bf16 %v1068_v38, %v1067_v36  ;;  %v1598_v41 = vpack.c.bf16 %v1084_v39, %v1083_v37 }
  0xfc   : > { %1698 = vst [vmem:[%s1908_s6 + $0x20] sm:$0xff] %v1558_v40  }
  0xfd   : > { %1706 = vst [vmem:[%s1908_s6 + $0x60] sm:$0xff] %v1598_v41  }
  0xfe   : > { %v802_v42 = vpop.f32.mrf.mxu2  ;;  %v842_v43 = vpop.f32.mrf.mxu3 }
  0xff   : > { %v1100_v46 = vmul.f32 %v1897_v14, %v802_v42  ;;  %v1116_v47 = vmul.f32 %v1897_v14, %v842_v43  ;;  %v725_v48 = vpop.f32.mrf.mxu0  ;;  %v765_v49 = vpop.f32.mrf.mxu1 }
 0x100   : > { %v1069_v56 = vmul.f32 %v1897_v14, %v725_v48  ;;  %v1085_v57 = vmul.f32 %v1897_v14, %v765_v49 }
 0x101   : > { %v1638_v50 = vpack.c.bf16 %v1100_v46, %v1099_v44  ;;  %v1678_v51 = vpack.c.bf16 %v1116_v47, %v1115_v45 }
 0x103   : > { %1714 = vst [vmem:[%s1908_s6 + $0xa0] sm:$0xff] %v1638_v50  }
 0x104   : > { %1722 = vst [vmem:[%s1908_s6 + $0xe0] sm:$0xff] %v1678_v51  }
 0x106   : > { %v805_v52 = vpop.f32.mrf.mxu2  ;;  %v845_v53 = vpop.f32.mrf.mxu3 }
 0x107   : > { %v727_v54 = vpop.f32.mrf.mxu0  ;;  %v767_v55 = vpop.f32.mrf.mxu1  ;;  %v1101_v0 = vmul.f32 %v1897_v14, %v805_v52  ;;  %v1117_v1 = vmul.f32 %v1897_v14, %v845_v53 }
 0x108   : > { %v1070_v58 = vmul.f32 %v1897_v14, %v727_v54  ;;  %v1086_v59 = vmul.f32 %v1897_v14, %v767_v55 }
 0x10a   : > { %v1563_v60 = vpack.c.bf16 %v1070_v58, %v1069_v56  ;;  %v1603_v61 = vpack.c.bf16 %v1086_v59, %v1085_v57 }
 0x10c   : > { %1699 = vst [vmem:[%s1908_s6 + $0x28] sm:$0xff] %v1563_v60  }
 0x10d   : > { %1707 = vst [vmem:[%s1908_s6 + $0x68] sm:$0xff] %v1603_v61  }
 0x10e   : > { %v807_v62 = vpop.f32.mrf.mxu2  ;;  %v847_v63 = vpop.f32.mrf.mxu3 }
 0x10f   : > { %v1102_v2 = vmul.f32 %v1897_v14, %v807_v62  ;;  %v1118_v3 = vmul.f32 %v1897_v14, %v847_v63  ;;  %v730_v4 = vpop.f32.mrf.mxu0  ;;  %v770_v5 = vpop.f32.mrf.mxu1 }
 0x110   : > { %v1071_v12 = vmul.f32 %v1897_v14, %v730_v4  ;;  %v1087_v13 = vmul.f32 %v1897_v14, %v770_v5 }
 0x111   : > { %v1643_v6 = vpack.c.bf16 %v1102_v2, %v1101_v0  ;;  %v1683_v7 = vpack.c.bf16 %v1118_v3, %v1117_v1 }
 0x113   : > { %1715 = vst [vmem:[%s1908_s6 + $0xa8] sm:$0xff] %v1643_v6  }
 0x114   : > { %1723 = vst [vmem:[%s1908_s6 + $0xe8] sm:$0xff] %v1683_v7  }
 0x116   : > { %v810_v8 = vpop.f32.mrf.mxu2  ;;  %v850_v9 = vpop.f32.mrf.mxu3 }
 0x117   : > { %v732_v10 = vpop.f32.mrf.mxu0  ;;  %v772_v11 = vpop.f32.mrf.mxu1  ;;  %v1103_v21 = vmul.f32 %v1897_v14, %v810_v8  ;;  %v1119_v22 = vmul.f32 %v1897_v14, %v850_v9 }
 0x118   : > { %v1072_v15 = vmul.f32 %v1897_v14, %v732_v10  ;;  %v1088_v16 = vmul.f32 %v1897_v14, %v772_v11 }
 0x11a   : > { %v1568_v17 = vpack.c.bf16 %v1072_v15, %v1071_v12  ;;  %v1608_v18 = vpack.c.bf16 %v1088_v16, %v1087_v13 }
 0x11c   : > { %1700 = vst [vmem:[%s1908_s6 + $0x30] sm:$0xff] %v1568_v17  }
 0x11d   : > { %1708 = vst [vmem:[%s1908_s6 + $0x70] sm:$0xff] %v1608_v18  }
 0x11e   : > { %v812_v19 = vpop.f32.mrf.mxu2  ;;  %v852_v20 = vpop.f32.mrf.mxu3 }
 0x11f   : > { %v1104_v23 = vmul.f32 %v1897_v14, %v812_v19  ;;  %v1120_v24 = vmul.f32 %v1897_v14, %v852_v20  ;;  %v735_v25 = vpop.f32.mrf.mxu0  ;;  %v775_v26 = vpop.f32.mrf.mxu1 }
 0x120   : > { %v1073_v33 = vmul.f32 %v1897_v14, %v735_v25  ;;  %v1089_v34 = vmul.f32 %v1897_v14, %v775_v26 }
 0x121   : > { %v1648_v27 = vpack.c.bf16 %v1104_v23, %v1103_v21  ;;  %v1688_v28 = vpack.c.bf16 %v1120_v24, %v1119_v22 }
 0x123   : > { %1716 = vst [vmem:[%s1908_s6 + $0xb0] sm:$0xff] %v1648_v27  }
 0x124   : > { %1724 = vst [vmem:[%s1908_s6 + $0xf0] sm:$0xff] %v1688_v28  }
 0x126   : > { %v815_v29 = vpop.f32.mrf.mxu2  ;;  %v855_v30 = vpop.f32.mrf.mxu3 }
 0x127   : > { %v737_v31 = vpop.f32.mrf.mxu0  ;;  %v777_v32 = vpop.f32.mrf.mxu1  ;;  %v1105_v41 = vmul.f32 %v1897_v14, %v815_v29  ;;  %v1121_v42 = vmul.f32 %v1897_v14, %v855_v30 }
 0x128   : > { %v1074_v35 = vmul.f32 %v1897_v14, %v737_v31  ;;  %v1090_v36 = vmul.f32 %v1897_v14, %v777_v32 }
 0x12a   : > { %v1573_v37 = vpack.c.bf16 %v1074_v35, %v1073_v33  ;;  %v1613_v38 = vpack.c.bf16 %v1090_v36, %v1089_v34 }
 0x12c   : > { %1701 = vst [vmem:[%s1908_s6 + $0x38] sm:$0xff] %v1573_v37  }
 0x12d   : > { %1709 = vst [vmem:[%s1908_s6 + $0x78] sm:$0xff] %v1613_v38  }
 0x12e   : > { %v817_v39 = vpop.f32.mrf.mxu2  ;;  %v857_v40 = vpop.f32.mrf.mxu3 }
 0x12f   : > { %v1106_v43 = vmul.f32 %v1897_v14, %v817_v39  ;;  %v1122_v44 = vmul.f32 %v1897_v14, %v857_v40 }
 0x131   : > { %v1653_v45 = vpack.c.bf16 %v1106_v43, %v1105_v41  ;;  %v1693_v46 = vpack.c.bf16 %v1122_v44, %v1121_v42 }
 0x133   : > { %1717 = vst [vmem:[%s1908_s6 + $0xb8] sm:$0xff] %v1653_v45  }
 0x134   : > { %1725 = vst [vmem:[%s1908_s6 + $0xf8] sm:$0xff] %v1693_v46  }
 0x135 PF: > { %s13_s14 = sadd.s32 1, %s1797_s14   ;;  %s2015_s12 = smov %s1793_s13 }
 0x136   : > { %p10_p5 = scmp.ge.s32.totalorder %s13_s14, 4   ;;  %s2016_s13 = smov %s2018_s15 }
 0x138   :  { %12 = sbr.rel (!%p10_p5) target bundleno = 2 (0x2), region = 76 }

</bundles_post_ra>
